<compile_context>
chip_gen: v5e
topology: v5e:2x2
jax: 0.10.0
libtpu: 0.0.40
codegen_flags: <defaults>
</compile_context>

<pallas_src>
import jax
import jax.numpy as jnp
from jax.experimental import pallas as pl
from jax.experimental.pallas import tpu as pltpu


def _round_up(x, m):
    return ((x + m - 1) // m) * m


# ----------------------------- Pallas kernel ------------------------------- #
def conv_pool_kernel(p_ref, cw_ref, pooled_ref):
    """One row tile = `bb` whole batch elements.

    p_ref      : (bb*HW, Kp)   im2col patches + ones column (zero-padded K dim)
    cw_ref     : (Kp, Fp)      conv weight with bias row, zero-padded to 128 lanes
    pooled_ref : (1, bb, Fp)   per-batch global-average-pooled features
    """
    bb = pooled_ref.shape[1]
    fp = pooled_ref.shape[2]
    hw = p_ref.shape[0] // bb

    # conv (+ bias via the folded ones column) as one MXU matmul, f32 acc.
    feat = jnp.dot(p_ref[...], cw_ref[...], preferred_element_type=jnp.float32)
    feat = jnp.maximum(feat, 0.0)                                # (bb*HW, Fp) f32

    # Global average pool over each contiguous HW row group.
    if bb == 1:
        pooled = jnp.mean(feat, axis=0, keepdims=True)           # (1, Fp)
    else:
        pooled = jnp.mean(feat.reshape(bb, hw, fp), axis=1)      # (bb, Fp)

    pooled_ref[...] = pooled[None].astype(pooled_ref.dtype)


# ------------------------------ host wrapper -------------------------------- #
def im2col_3x3(x_nchw):
    """(B, C, H, W) -> (B, H*W, C*9), 'same' padding, stride 1.

    Patch order (C, KH, KW) matches PyTorch Conv2d weight
    (C_out, C_in, KH, KW).reshape(C_out, -1).T.
    """
    B, C, H, W = x_nchw.shape
    xp = jnp.pad(x_nchw, ((0, 0), (0, 0), (1, 1), (1, 1)))
    cols = [xp[:, :, kh:kh + H, kw:kw + W] for kh in range(3) for kw in range(3)]
    patches = jnp.stack(cols, axis=2)                 # (B, C, 9, H, W)
    patches = patches.reshape(B, C * 9, H * W)
    return jnp.transpose(patches, (0, 2, 1))          # (B, H*W, C*9)


def model_forward(x_nchw, conv_w, conv_b, fc_w, fc_b, *, mxu_dtype=jnp.float32):
    """x_nchw: (B, C_in, H, W) float32 -> (B, 1) float32."""
    B, C, H, W = x_nchw.shape
    HW = H * W
    F = conv_w.shape[0]
    K = C * 9
    Kb = K + 1                             # +1 column of ones carries the bias
    Kp = _round_up(Kb, 32)                 # sublane-aligned contraction depth
    Fp = _round_up(max(F, 128), 128)       # lane-dense feature axis

    # Host im2col, flattened into one tall (B*HW, Kp) LHS with a ones column
    # so the conv bias rides along the (already padded) contraction axis.
    # TODO(synk): for real image sizes move the conv in-kernel (shifted-view
    # matmuls over an HW grid axis with a pooled accumulator) to avoid the 9x
    # HBM blowup and fit the v7x 64 MiB VMEM budget.
    patches = im2col_3x3(x_nchw).reshape(B * HW, K)
    patches = jnp.concatenate(
        [patches, jnp.ones((B * HW, 1), patches.dtype)], axis=1)      # (B*HW, K+1)
    patches = jnp.pad(patches, ((0, 0), (0, Kp - Kb))).astype(mxu_dtype)

    cw = jnp.concatenate(
        [conv_w.reshape(F, K).T, conv_b.reshape(1, F)], axis=0)        # (K+1, F)
    cw = jnp.pad(cw, ((0, Kp - Kb), (0, Fp - F))).astype(mxu_dtype)    # (Kp, Fp)

    # Batch elements per row tile: large matmul per step, but keep >= 2 grid
    # steps when B >= 2 so both v7x TensorCores are fed (costs nothing on
    # single-TC v5e/v6e).
    bb = max(1, 1024 // HW)
    if B >= 2:
        bb = min(bb, B // 2)
    bb = max(1, min(bb, B))
    while B % bb:
        bb -= 1
    n_tiles = B // bb

    pooled = pl.pallas_call(
        conv_pool_kernel,
        out_shape=jax.ShapeDtypeStruct((n_tiles, bb, Fp), jnp.float32),
        grid=(n_tiles,),
        in_specs=[
            pl.BlockSpec((bb * HW, Kp), lambda i: (i, 0)),   # row tile of patches
            pl.BlockSpec((Kp, Fp), lambda i: (0, 0)),        # conv weight (resident)
        ],
        out_specs=pl.BlockSpec((1, bb, Fp), lambda i: (i, 0, 0)),
        compiler_params=pltpu.CompilerParams(
            dimension_semantics=("parallel",)),
    )(patches, cw)

    pooled = pooled.reshape(B, Fp)[:, :F]        # drop zero-padded lanes

    # Tiny fc head Linear(F, 1): cheaper as a plain XLA dot than a 1-wide
    # masked store from the kernel.
    return pooled @ fc_w.reshape(1, F).T + fc_b.reshape(1, 1)


# -------------------------------- reference --------------------------------- #
def reference_forward(x_nchw, conv_w, conv_b, fc_w, fc_b):
    B, C, H, W = x_nchw.shape
    F = conv_w.shape[0]
    patches = im2col_3x3(x_nchw)                              # (B, HW, C*9)
    cw = conv_w.reshape(F, -1).T
    feat = jnp.maximum(patches @ cw + conv_b[None, None, :], 0.0)
    pooled = feat.mean(axis=1)                                # (B, F)
    return pooled @ fc_w.reshape(1, F).T + fc_b.reshape(1, 1)


# ---------------------------------- main ------------------------------------ #
if __name__ == "__main__":
    B, C_in, H, W = 2, 2, 16, 16       # in_chans=2 per module default
    n_features = 32                    # synthetic backbone feature width

    key = jax.random.PRNGKey(0)
    kx, kcw, kcb, kfw, kfb = jax.random.split(key, 5)

    x = jax.random.normal(kx, (B, C_in, H, W), dtype=jnp.float32)
    conv_w = 0.1 * jax.random.normal(kcw, (n_features, C_in, 3, 3), jnp.float32)
    conv_b = 0.1 * jax.random.normal(kcb, (n_features,), jnp.float32)
    fc_w = 0.1 * jax.random.normal(kfw, (1, n_features), jnp.float32)   # Linear(F,1).weight
    fc_b = 0.1 * jax.random.normal(kfb, (1,), jnp.float32)              # Linear(F,1).bias

    ref = reference_forward(x, conv_w, conv_b, fc_w, fc_b)

    # f32 MXU inputs (exact path, good on all generations).
    out = jax.block_until_ready(model_forward(x, conv_w, conv_b, fc_w, fc_b))
    assert out.shape == (B, 1)
    assert jnp.allclose(out, ref, atol=1e-4, rtol=1e-4)

    # bf16 MXU inputs (recommended for v6e/v7x); accumulation stays f32.
    out_bf16 = jax.block_until_ready(
        model_forward(x, conv_w, conv_b, fc_w, fc_b, mxu_dtype=jnp.bfloat16))
    assert out_bf16.shape == (B, 1)
    assert jnp.allclose(out_bf16, ref, atol=5e-2, rtol=5e-2)

    print("KERNEL_OK")
</pallas_src>

<mosaic_0001>
module attributes {stable_mosaic.version = 11 : i64} {
  func.func @conv_pool_kernel(%arg0: i32, %arg1: memref<256x32xf32, #tpu.memory_space<vmem>>, %arg2: memref<32x128xf32, #tpu.memory_space<vmem>>, %arg3: memref<1x1x128xf32, #tpu.memory_space<vmem>>) attributes {dimension_semantics = [#tpu.dimension_semantics<parallel>], iteration_bounds = array<i64: 2>, scalar_prefetch = 0 : i64, scratch_operands = 0 : i64, tpu.core_type = #tpu.core_type<tc>, window_params = [{transform_indices = @transform_0, window_bounds = array<i64: 256, 32>}, {pipeline_mode = #tpu.pipeline_mode<synchronous>, transform_indices = @transform_1, window_bounds = array<i64: 32, 128>}, {transform_indices = @transform_2, window_bounds = array<i64: 1, 1, 128>}]} {
    %c0 = arith.constant 0 : index
    %c0_0 = arith.constant 0 : index
    %0 = vector.load %arg1[%c0, %c0_0] : memref<256x32xf32, #tpu.memory_space<vmem>>, vector<256x32xf32>
    %c0_1 = arith.constant 0 : index
    %c0_2 = arith.constant 0 : index
    %1 = vector.load %arg2[%c0_1, %c0_2] : memref<32x128xf32, #tpu.memory_space<vmem>>, vector<32x128xf32>
    %cst = arith.constant dense<0.000000e+00> : vector<256x128xf32>
    %2 = tpu.matmul %0, %1, %cst {dimension_numbers = #tpu.dot_dimension_numbers<[1], [0], [0], [1], [0, 0, 1, 1], [], []>} : vector<256x32xf32>, vector<32x128xf32>, vector<256x128xf32> -> vector<256x128xf32>
    %cst_3 = arith.constant 0.000000e+00 : f32
    %3 = vector.broadcast %cst_3 : f32 to vector<256x128xf32>
    %4 = arith.maximumf %2, %3 : vector<256x128xf32>
    %cst_4 = arith.constant dense<0.000000e+00> : vector<128xf32>
    %5 = vector.multi_reduction <add>, %4, %cst_4 [0] : vector<256x128xf32> to vector<128xf32>
    %6 = vector.shape_cast %5 : vector<128xf32> to vector<1x128xf32>
    %cst_5 = arith.constant 2.560000e+02 : f32
    %7 = vector.broadcast %cst_5 : f32 to vector<1x128xf32>
    %8 = arith.divf %6, %7 : vector<1x128xf32>
    %9 = vector.shape_cast %8 : vector<1x128xf32> to vector<1x1x128xf32>
    %c0_6 = arith.constant 0 : index
    %c0_7 = arith.constant 0 : index
    %c0_8 = arith.constant 0 : index
    %10 = vector.load %arg3[%c0_6, %c0_7, %c0_8] : memref<1x1x128xf32, #tpu.memory_space<vmem>>, vector<1x1x128xf32>
    tpu.vector_store %arg3[%c0_6, %c0_7, %c0_8], %9 {strides = array<i32>} : memref<1x1x128xf32, #tpu.memory_space<vmem>>, vector<1x1x128xf32>,
    return
  }
  func.func @transform_0(%arg0: i32) -> (i32, i32) {
    %c0_i32 = arith.constant 0 : i32
    %c0_i32_0 = arith.constant 0 : i32
    return %arg0, %c0_i32 : i32, i32
  }
  func.func @transform_1(%arg0: i32) -> (i32, i32) {
    %c0_i32 = arith.constant 0 : i32
    %c0_i32_0 = arith.constant 0 : i32
    %c0_i32_1 = arith.constant 0 : i32
    return %c0_i32, %c0_i32_0 : i32, i32
  }
  func.func @transform_2(%arg0: i32) -> (i32, i32, i32) {
    %c0_i32 = arith.constant 0 : i32
    %c0_i32_0 = arith.constant 0 : i32
    %c0_i32_1 = arith.constant 0 : i32
    return %arg0, %c0_i32, %c0_i32_0 : i32, i32, i32
  }
}

</mosaic_0001>

<bundles_post_ra>
// kernel: tpu_custom_call.1
= control target key start
LH: loop header
LB: loop body
LE: loop exit
PB: predicated region body
PF: predicated region fallthrough
CT: control target
= control target key end

     0   :  { %7 = vsyncpa [#allocation3], 0  ;;  %s877_s0 = inlined_call_operand.vmem [shape: f32[512,32], index: 0, kind: input, shape index: {}]   ;;  %s878_s1 = inlined_call_operand.vmem [shape: f32[32,128], index: 1, kind: input, shape index: {}]   ;;  %s879_s2 = inlined_call_operand.hbm [shape: f32[2,1,128], index: 2, kind: output, shape index: {}]  }
   0x1   :  { %9 = vsyncpa [#allocation3 + $0x1], 0  ;;  %s709_s9 = smov 0   ;;  %s711_s10 = smov 0  }
   0x2   :  { %s713_s11 = smov 0   ;;  %s715_s12 = smov 0  }
   0x3 LB: > { %s730_s13 = sadd.s32 4294967295, %s691_s12   ;;  %s535_s14 = sadd.s32 4294967294, %s691_s12   ;;  %s691_s12 = sphi %s715_s12, %s885_s12   ;;  %s687_s11 = sphi %s713_s11, %s884_s11   ;;  %s683_s10 = sphi %s711_s10, %s883_s10   ;;  %s679_s9 = sphi %s709_s9, %s882_s9  }
   0x4   : > { %s734_s15 = sadd.s32 1, %s691_s12   ;;  %s69_s16 = sadd.s32 1, %s687_s11 }
   0x5   : > { %s66_s17 = ssub.s32 %s691_s12, %s734_s15  ;;  %p79_p0 = scmp.ne.s32.totalorder %s687_s11, %s683_s10 }
   0x6   : > { %p67_p1 = scmp.eq.s32.totalorder %s66_s17, 0  ;;  %p80_p2 = scmp.eq.s32.totalorder %s730_s13, 1 }
   0x7   : > { %p85_p3 = scmp.ne.s32.totalorder %s683_s10, %s679_s9  ;;  %p86_p4 = scmp.eq.s32.totalorder %s535_s14, 1 }
   0x8   : > { %s745_s18 = scalar_select %p67_p1, %s687_s11, %s69_s16  }
   0x9   : > { %p747_p5 = por %p80_p2, %p79_p0  ;;  %p751_p6 = por %p86_p4, %p85_p3 }
   0xa   : > { %p538_p7 = scmp.ge.s32.totalorder %s691_s12, 1  ;;  %p116_p8 = scmp.lt.s32.totalorder %s691_s12, 3 }
   0xc   : > { %p117_p9 = pnand %p538_p7, %p116_p8 }
   0xd   : > { %s539_s25 = sshll.u32 (!%p117_p9), %s730_s13, 5  ;;  %s135_s6 = sand.u32 (!%p117_p9), 1, %s683_s10  }
   0xe   : > { %120 = sbr.rel (%p117_p9) target bundleno = 278 (0x116), region = 28  ;;  %p138_p10 = scmp.lt.s32.totalorder (!%p117_p9), %s539_s25, 63 }
   0xf   : > { %s476_s14 = scalar_lea.hbm (!%p117_p9), %s879_s2, %s730_s13  ;;  %s136_s16 = scalar_lea.vmem (!%p117_p9), [#allocation2], %s135_s6 }
  0x10   : > { %s478_s17 = sshll.u32 (!%p117_p9), %s136_s16, 4  ;;  %s480_s21 = sshll.u32 (!%p117_p9), %s476_s14, 4  ;;  %s479_s17 = int_to_ptr.vmem [resolvable:$true] %s478_s17  ;;  %s481_s21 = int_to_ptr.hbm [resolvable:$true] %s480_s21 }
  0x11   : > { %s468_s22 = scalar_lea.sflag (!%p117_p9), [#allocation3], %s135_s6  ;;  %s643_s23 = sshra.s32 (!%p117_p9), %s481_s21, 4  ;;  %s644_s23 = int_to_ptr.hbm [resolvable:$true] %s643_s23 }
  0x12   : > { %s645_s24 = scalar_lea.hbm (!%p117_p9), %s644_s23, 1  ;;  %s649_s26 = scalar_lea.hbm (!%p117_p9), %s879_s2, 2 }
  0x13   : > { %v178_v0 = vld [vmem:[%s878_s1 + $0x18] sm:$0xff]  ;;  %v177_v1 = vld [vmem:[%s878_s1 + $0x10] sm:$0xff]  ;;  %v176_v2 = vld [vmem:[%s878_s1 + $0x8] sm:$0xff]  ;;  %s887_s25 = smov (!%p138_p10, %s539_s25), 63  ;;  %vm179_vm0 = vcmask 261120   ;;  %p646_p11 = scmp.ne.s32.totalorder %s644_s23, %s645_s24 }
  0x14   : > { %288 = vmatpush.msra.mxu0 %v178_v0  ;;  %575 = vmatpush.msra.mxu1 %v178_v0  ;;  %v175_v3 = vld [vmem:[%s878_s1] sm:$0xff]  ;;  %s540_s30 = sshll.u32 %s887_s25, 3  ;;  %p650_p0 = scmp.lt.s32.totalorder %s644_s23, %s879_s2 }
  0x15   : > { %576 = vmatpush.msra.mxu2 %v178_v0  ;;  %577 = vmatpush.msra.mxu3 %v178_v0  ;;  %s773_s5 = scalar_lea.vmem %s877_s0, %s540_s30  ;;  %p647_p12 = pnand %p646_p11, %p747_p5 }
  0x16   : > { %289 = vmatpush.msra.mxu0 %v177_v1  ;;  %578 = vmatpush.msra.mxu1 %v177_v1  ;;  %v143_v4 = vld [vmem:[%s773_s5] sm:$0xff]  ;;  %v144_v7 = vld [vmem:[%s773_s5 + $0x8] sm:$0xff]  ;;  %v145_v11 = vld [vmem:[%s773_s5 + $0x10] sm:$0xff]  ;;  %p651_p1 = scmp.lt.s32.totalorder %s649_s26, %s645_s24 }
  0x17   : > { %579 = vmatpush.msra.mxu2 %v177_v1  ;;  %580 = vmatpush.msra.mxu3 %v177_v1  ;;  %v151_v5 = vld [vmem:[%s773_s5 + $0x40] sm:$0xff]  ;;  %v152_v8 = vld [vmem:[%s773_s5 + $0x48] sm:$0xff]  ;;  %v153_v12 = vld [vmem:[%s773_s5 + $0x50] sm:$0xff]  ;;  %p648_p13 = pneg %p647_p12 }
  0x18   : > { %290 = vmatpush.msra.mxu0 %v176_v2  ;;  %581 = vmatpush.msra.mxu1 %v176_v2  ;;  %v159_v6 = vld [vmem:[%s773_s5 + $0x80] sm:$0xff]  ;;  %v160_v9 = vld [vmem:[%s773_s5 + $0x88] sm:$0xff]  ;;  %v161_v13 = vld [vmem:[%s773_s5 + $0x90] sm:$0xff]  ;;  %p652_p2 = por %p651_p1, %p650_p0 }
  0x19   : > { %582 = vmatpush.msra.mxu2 %v176_v2  ;;  %583 = vmatpush.msra.mxu3 %v176_v2  ;;  %v167_v10 = vld [vmem:[%s773_s5 + $0xc0] sm:$0xff]  ;;  %v168_v14 = vld [vmem:[%s773_s5 + $0xc8] sm:$0xff]  ;;  %v146_v15 = vld [vmem:[%s773_s5 + $0x18] sm:$0xff] }
  0x1a   : > { %291 = vmatpush.msra.mxu0 %v175_v3  ;;  %584 = vmatpush.msra.mxu1 %v175_v3  ;;  %v154_v16 = vld [vmem:[%s773_s5 + $0x58] sm:$0xff]  ;;  %v169_v18 = vld [vmem:[%s773_s5 + $0xd0] sm:$0xff]  ;;  %v147_v19 = vld [vmem:[%s773_s5 + $0x20] sm:$0xff]  ;;  %p653_p3 = pnand %p652_p2, %p648_p13 }
  0x1b   : > { %541 = vmatmul.msk.f32.vlgmr.msra.gmra.mxu0 %vm179_vm0, %v143_v4  ;;  %585 = vmatpush.msra.mxu2 %v175_v3  ;;  %v162_v17 = vld [vmem:[%s773_s5 + $0x98] sm:$0xff]  ;;  %v155_v20 = vld [vmem:[%s773_s5 + $0x60] sm:$0xff]  ;;  %v148_v23 = vld [vmem:[%s773_s5 + $0x28] sm:$0xff] }
  0x1c   : > { %549 = vmatmul.msk.f32.vlgmr.msra.gmra.mxu1 %vm179_vm0, %v151_v5  ;;  %586 = vmatpush.msra.mxu3 %v175_v3  ;;  %v170_v21 = vld [vmem:[%s773_s5 + $0xd8] sm:$0xff]  ;;  %v163_v22 = vld [vmem:[%s773_s5 + $0xa0] sm:$0xff]  ;;  %v156_v24 = vld [vmem:[%s773_s5 + $0x68] sm:$0xff] }
  0x1d   : > { %557 = vmatmul.msk.f32.vlgmr.msra.gmra.mxu2 %vm179_vm0, %v159_v6  ;;  %565 = vmatmul.msk.f32.vlgmr.msra.gmra.mxu3 %vm179_vm0, %v167_v10  ;;  %v171_v25 = vld [vmem:[%s773_s5 + $0xe0] sm:$0xff]  ;;  %v164_v26 = vld [vmem:[%s773_s5 + $0xa8] sm:$0xff]  ;;  %v149_v27 = vld [vmem:[%s773_s5 + $0x30] sm:$0xff] }
  0x1e   : > { %v157_v28 = vld [vmem:[%s773_s5 + $0x70] sm:$0xff]  ;;  %v172_v29 = vld [vmem:[%s773_s5 + $0xe8] sm:$0xff]  ;;  %v150_v31 = vld [vmem:[%s773_s5 + $0x38] sm:$0xff] }
  0x1f   : > { %v165_v30 = vld [vmem:[%s773_s5 + $0xb0] sm:$0xff]  ;;  %v158_v32 = vld [vmem:[%s773_s5 + $0x78] sm:$0xff] }
  0x20   : > { %v173_v33 = vld [vmem:[%s773_s5 + $0xf0] sm:$0xff]  ;;  %v166_v34 = vld [vmem:[%s773_s5 + $0xb8] sm:$0xff] }
  0x21   : > { %v174_v35 = vld [vmem:[%s773_s5 + $0xf8] sm:$0xff] }
  0x23   : > { %542 = vmatmul.msk.f32.gmra.mxu0 %vm179_vm0, %v144_v7 }
  0x24   : > { %550 = vmatmul.msk.f32.gmra.mxu1 %vm179_vm0, %v152_v8 }
  0x25   : > { %558 = vmatmul.msk.f32.gmra.mxu2 %vm179_vm0, %v160_v9  ;;  %566 = vmatmul.msk.f32.gmra.mxu3 %vm179_vm0, %v168_v14 }
  0x2b   : > { %543 = vmatmul.msk.f32.gmra.mxu0 %vm179_vm0, %v145_v11 }
  0x2c   : > { %551 = vmatmul.msk.f32.gmra.mxu1 %vm179_vm0, %v153_v12 }
  0x2d   : > { %559 = vmatmul.msk.f32.gmra.mxu2 %vm179_vm0, %v161_v13  ;;  %567 = vmatmul.msk.f32.gmra.mxu3 %vm179_vm0, %v169_v18 }
  0x33   : > { %544 = vmatmul.msk.f32.gmra.mxu0 %vm179_vm0, %v146_v15 }
  0x34   : > { %552 = vmatmul.msk.f32.gmra.mxu1 %vm179_vm0, %v154_v16 }
  0x35   : > { %560 = vmatmul.msk.f32.gmra.mxu2 %vm179_vm0, %v162_v17  ;;  %568 = vmatmul.msk.f32.gmra.mxu3 %vm179_vm0, %v170_v21 }
  0x3b   : > { %545 = vmatmul.msk.f32.gmra.mxu0 %vm179_vm0, %v147_v19 }
  0x3c   : > { %553 = vmatmul.msk.f32.gmra.mxu1 %vm179_vm0, %v155_v20 }
  0x3d   : > { %561 = vmatmul.msk.f32.gmra.mxu2 %vm179_vm0, %v163_v22  ;;  %569 = vmatmul.msk.f32.gmra.mxu3 %vm179_vm0, %v171_v25 }
  0x43   : > { %546 = vmatmul.msk.f32.gmra.mxu0 %vm179_vm0, %v148_v23 }
  0x44   : > { %554 = vmatmul.msk.f32.gmra.mxu1 %vm179_vm0, %v156_v24 }
  0x45   : > { %562 = vmatmul.msk.f32.gmra.mxu2 %vm179_vm0, %v164_v26  ;;  %570 = vmatmul.msk.f32.gmra.mxu3 %vm179_vm0, %v172_v29 }
  0x4b   : > { %547 = vmatmul.msk.f32.gmra.mxu0 %vm179_vm0, %v149_v27 }
  0x4c   : > { %555 = vmatmul.msk.f32.gmra.mxu1 %vm179_vm0, %v157_v28 }
  0x4d   : > { %563 = vmatmul.msk.f32.gmra.mxu2 %vm179_vm0, %v165_v30  ;;  %571 = vmatmul.msk.f32.gmra.mxu3 %vm179_vm0, %v173_v33 }
  0x53   : > { %548 = vmatmul.msk.f32.gmra.mxu0 %vm179_vm0, %v150_v31 }
  0x54   : > { %556 = vmatmul.msk.f32.gmra.mxu1 %vm179_vm0, %v158_v32 }
  0x55   : > { %564 = vmatmul.msk.f32.gmra.mxu2 %vm179_vm0, %v166_v34  ;;  %572 = vmatmul.msk.f32.gmra.mxu3 %vm179_vm0, %v174_v35 }
  0x98   : > { %v293_v36 = vpop.f32.mrf.mxu0 }
  0x99   : > { %v317_v37 = vpop.f32.mrf.mxu1  ;;  %v389_v54 = vmax.f32 %v293_v36, 0.0 }
  0x9a   : > { %v397_v9 = vmax.f32 %v317_v37, 0.0 }
  0xa0   : > { %v296_v38 = vpop.f32.mrf.mxu0  ;;  %v341_v40 = vpop.f32.mrf.mxu2 }
  0xa1   : > { %v320_v39 = vpop.f32.mrf.mxu1  ;;  %v839_v46 = vpop.f32.mrf.mxu3  ;;  %v390_v52 = vmax.f32 %v296_v38, 0.0  ;;  %v405_v30 = vmax.f32 %v341_v40, 0.0 }
  0xa2   : > { %v398_v12 = vmax.f32 %v320_v39, 0.0  ;;  %v413_v40 = vmax.f32 %v839_v46, 0.0 }
  0xa3   : > { %v421_v56 = vadd.f32 %v390_v52, %v389_v54 }
  0xa8   : > { %v299_v41 = vpop.f32.mrf.mxu0  ;;  %v344_v44 = vpop.f32.mrf.mxu2 }
  0xa9   : > { %v323_v42 = vpop.f32.mrf.mxu1  ;;  %v841_v51 = vpop.f32.mrf.mxu3  ;;  %v391_v55 = vmax.f32 %v299_v41, 0.0  ;;  %v406_v32 = vmax.f32 %v344_v44, 0.0 }
  0xaa   : > { %v399_v14 = vmax.f32 %v323_v42, 0.0  ;;  %v414_v44 = vmax.f32 %v841_v51, 0.0 }
  0xab   : > { %v422_v60 = vadd.f32 %v421_v56, %v391_v55  ;;  %v693_v56 = vmov 256.0  }
  0xac   : > { %627 = vrcp.f32 %v693_v56 }
  0xb0   : > { %v302_v43 = vpop.f32.mrf.mxu0  ;;  %v347_v48 = vpop.f32.mrf.mxu2 }
  0xb1   : > { %v326_v45 = vpop.f32.mrf.mxu1  ;;  %v392_v57 = vmax.f32 %v302_v43, 0.0  ;;  %v371_v62 = vpop.f32.mrf.mxu3  ;;  %v407_v34 = vmax.f32 %v347_v48, 0.0 }
  0xb2   : > { %v400_v17 = vmax.f32 %v326_v45, 0.0 }
  0xb3   : > { %v423_v63 = vadd.f32 %v422_v60, %v392_v57  ;;  %v628_v60 = vpop.eup %627 }
  0xb4   : > { %vm463_vm1 = vweird.f32 %v628_v60 }
  0xb8   : > { %v305_v47 = vpop.f32.mrf.mxu0  ;;  %v350_v53 = vpop.f32.mrf.mxu2 }
  0xb9   : > { %v329_v49 = vpop.f32.mrf.mxu1  ;;  %v393_v61 = vmax.f32 %v305_v47, 0.0  ;;  %v374_v11 = vpop.f32.mrf.mxu3  ;;  %v408_v37 = vmax.f32 %v350_v53, 0.0  ;;  %v415_v53 = vmax.f32 %v371_v62, 0.0 }
  0xba   : > { %v401_v19 = vmax.f32 %v329_v49, 0.0 }
  0xbb   : > { %v424_v1 = vadd.f32 %v423_v63, %v393_v61 }
  0xc0   : > { %v308_v50 = vpop.f32.mrf.mxu0  ;;  %v353_v3 = vpop.f32.mrf.mxu2 }
  0xc1   : > { %v332_v59 = vpop.f32.mrf.mxu1  ;;  %v394_v0 = vmax.f32 %v308_v50, 0.0  ;;  %v377_v24 = vpop.f32.mrf.mxu3  ;;  %v409_v39 = vmax.f32 %v353_v3, 0.0  ;;  %v459_v3 = vmul.f32 256.0, %v628_v60 }
  0xc2   : > { %v402_v22 = vmax.f32 %v332_v59, 0.0  ;;  %v417_v61 = vmax.f32 %v377_v24, 0.0 }
  0xc3   : > { %v425_v4 = vadd.f32 %v424_v1, %v394_v0 }
  0xc8   : > { %v311_v58 = vpop.f32.mrf.mxu0  ;;  %v356_v16 = vpop.f32.mrf.mxu2 }
  0xc9   : > { %v395_v2 = vmax.f32 %v311_v58, 0.0  ;;  %v335_v8 = vpop.f32.mrf.mxu1  ;;  %v380_v36 = vpop.f32.mrf.mxu3  ;;  %v410_v43 = vmax.f32 %v356_v16, 0.0  ;;  %v416_v58 = vmax.f32 %v374_v11, 0.0 }
  0xca   : > { %v403_v26 = vmax.f32 %v335_v8, 0.0  ;;  %v418_v1 = vmax.f32 %v380_v36, 0.0 }
  0xcb   : > { %v426_v6 = vadd.f32 %v425_v4, %v395_v2 }
  0xd0   : > { %v314_v5 = vpop.f32.mrf.mxu0  ;;  %v359_v29 = vpop.f32.mrf.mxu2 }
  0xd1   : > { %v396_v7 = vmax.f32 %v314_v5, 0.0  ;;  %v338_v21 = vpop.f32.mrf.mxu1  ;;  %v411_v49 = vmax.f32 %v359_v29, 0.0  ;;  %v383_v54 = vpop.f32.mrf.mxu3 }
  0xd2   : > { %v404_v27 = vmax.f32 %v338_v21, 0.0  ;;  %v419_v4 = vmax.f32 %v383_v54, 0.0 }
  0xd3   : > { %v427_v10 = vadd.f32 %v426_v6, %v396_v7  ;;  %v460_v6 = vsub.f32 1.0, %v459_v3 }
  0xd5   : > { %v428_v13 = vadd.f32 %v427_v10, %v397_v9  ;;  %v461_v62 = vmul.f32 %v628_v60, %v460_v6 }
  0xd7   : > { %v429_v15 = vadd.f32 %v428_v13, %v398_v12  ;;  %v462_v11 = vadd.f32 %v628_v60, %v461_v62 }
  0xd8   : > { %v362_v42 = vpop.f32.mrf.mxu2 }
  0xd9   : > { %v430_v18 = vadd.f32 %v429_v15, %v399_v14  ;;  %v412_v50 = vmax.f32 %v362_v42, 0.0  ;;  %v386_v0 = vpop.f32.mrf.mxu3  ;;  %v464_v14 = vsel %vm463_vm1, %v628_v60, %v462_v11 }
  0xda   : > { %v420_v5 = vmax.f32 %v386_v0, 0.0 }
  0xdb   : > { %v431_v20 = vadd.f32 %v430_v18, %v400_v17 }
  0xdd   : > { %v432_v23 = vadd.f32 %v431_v20, %v401_v19 }
  0xdf   : > { %v433_v25 = vadd.f32 %v432_v23, %v402_v22 }
  0xe1   : > { %v434_v28 = vadd.f32 %v433_v25, %v403_v26 }
  0xe3   : > { %v435_v31 = vadd.f32 %v434_v28, %v404_v27 }
  0xe5   : > { %v436_v33 = vadd.f32 %v435_v31, %v405_v30 }
  0xe7   : > { %v437_v35 = vadd.f32 %v436_v33, %v406_v32 }
  0xe9   : > { %v438_v38 = vadd.f32 %v437_v35, %v407_v34 }
  0xeb   : > { %v439_v41 = vadd.f32 %v438_v38, %v408_v37 }
  0xed   : > { %v440_v45 = vadd.f32 %v439_v41, %v409_v39 }
  0xef   : > { %v441_v47 = vadd.f32 %v440_v45, %v410_v43 }
  0xf1   : > { %v442_v52 = vadd.f32 %v441_v47, %v411_v49 }
  0xf3   : > { %v443_v55 = vadd.f32 %v442_v52, %v412_v50 }
  0xf5   : > { %v444_v48 = vadd.f32 %v443_v55, %v413_v40 }
  0xf7   : > { %v445_v57 = vadd.f32 %v444_v48, %v414_v44 }
  0xf9   : > { %v446_v59 = vadd.f32 %v445_v57, %v415_v53 }
  0xfb   : > { %v447_v63 = vadd.f32 %v446_v59, %v416_v58 }
  0xfd   : > { %v448_v2 = vadd.f32 %v447_v63, %v417_v61 }
  0xff   : > { %v449_v46 = vadd.f32 %v448_v2, %v418_v1 }
 0x101   : > { %v450_v51 = vadd.f32 %v449_v46, %v419_v4 }
 0x103   : > { %v451_v7 = vadd.f32 %v450_v51, %v420_v5 }
 0x105   : > { %v452_v8 = vrot.slane %v451_v7, 4 }
 0x107   : > { %v453_v9 = vadd.f32 %v452_v8, %v451_v7 }
 0x109   : > { %v454_v10 = vrot.slane %v453_v9, 2 }
 0x10b   : > { %v455_v12 = vadd.f32 %v454_v10, %v453_v9 }
 0x10d   : > { %v456_v13 = vrot.slane %v455_v12, 1 }
 0x10f   : > { %v457_v15 = vadd.f32 %v456_v13, %v455_v12 }
 0x111   : > { %v465_v16 = vmul.f32 %v464_v14, %v457_v15 }
 0x113   : > { %466 = vst [vmem:[%s136_s16] sm:$0x1] %v465_v16 }
 0x114   : > { %656 = shalt.err (!%p653_p3)
}
 0x115   : > { %587 = dma.vmem_to_hbm [thread:$0]  (%p747_p5), %s479_s17, 16, %s481_s21, %s468_s22  }
 0x116 PF: > { %p593_p4 = scmp.ge.s32.totalorder %s691_s12, 2  ;;  %s492_s29 = sand.u32 1, %s679_s9  }
 0x117   : > { %s493_s30 = scalar_lea.sflag [#allocation3], %s492_s29 }
 0x118   : > { %p590_p7 = pnand %p593_p4, %p751_p6 }
 0x11a   : > { %p591_p8 = pneg %p590_p7 }
 0x11c   : > { %674 = dma.done.wait (%p591_p8), %s493_s30, 16  }
 0x11d   : > { %676 = vsyncadd (%p591_p8), %s493_s30, 4294967280  ;;  %p12_p9 = scmp.ge.s32.totalorder %s734_s15, 4   ;;  %s882_s9 = smov %s683_s10 }
 0x11e   : > { %s883_s10 = smov %s687_s11  ;;  %s884_s11 = smov %s745_s18 }
 0x11f   : > { %s885_s12 = smov %s734_s15  ;;  %14 = sbr.rel (!%p12_p9) target bundleno = 3 (0x3), region = 63 }
 0x124   :  { %498 = vsyncpa [#allocation3], 1 }
 0x125   :  { %500 = vsyncpa [#allocation3 + $0x1], 1 }

</bundles_post_ra>
